<compile_context>
chip_gen: v7x
topology: tpu7x:2x2x1
jax: 0.10.0
libtpu: 0.0.40
codegen_flags: <defaults>
</compile_context>

<pallas_src>
import functools
import numpy as np
import jax
import jax.numpy as jnp
from jax import lax
from jax.experimental import pallas as pl
from jax.experimental.pallas import tpu as pltpu  # noqa: F401  (kept for TPU-specific params if scaled up)

EPS = 1e-5  # torch.nn.LayerNorm default eps


# ----------------------------- Pallas kernels ------------------------------

def qkv_kernel(x_ref, pe_ref, wqkv_ref, bqkv_ref, res_ref, qkv_ref, *, batch, add_pe):
    """residual = x (+ PE broadcast over batch);  qkv = residual @ [Wq|Wk|Wv]^T + [bq|bk|bv].

    The attention scale is already folded into the Wq / bq columns of wqkv/bqkv.
    """
    x = x_ref[...]                                                   # [B*L, D]
    if add_pe:
        # In-register broadcast of the [L, D] PE table over the batch dimension.
        pe = jnp.concatenate([pe_ref[...]] * batch, axis=0)          # [B*L, D]
        x = x + pe
    res_ref[...] = x
    qkv_ref[...] = (jnp.dot(x, wqkv_ref[...], preferred_element_type=jnp.float32)
                    + bqkv_ref[...])                                 # [B*L, 3D]


def attn_kernel(q_ref, k_ref, v_ref, o_ref):
    """softmax(q @ k^T, dim=-1) @ v for all (batch*head) groups at once.

    scale was folded into q's projection weights, so no per-score multiply is needed.
    """
    q = q_ref[...]                                                   # [G, L, dph]
    k = k_ref[...]
    v = v_ref[...]
    s = jnp.einsum("gqd,gkd->gqk", q, k,
                   preferred_element_type=jnp.float32)               # [G, L, L]
    s = s - jnp.max(s, axis=-1, keepdims=True)                       # stable softmax (dim=2)
    p = jnp.exp(s)
    p = p * pl.reciprocal(jnp.sum(p, axis=-1, keepdims=True), approx=True)
    o_ref[...] = jnp.einsum("gqk,gkd->gqd", p, v,
                            preferred_element_type=jnp.float32)      # [G, L, dph]


def proj_ln_ffn_kernel(ctx_ref, res_ref, wo_ref, bo_ref, g1_ref, be1_ref,
                       w1_ref, b1_ref, w2_ref, b2_ref, g2_ref, be2_ref,
                       o_ref, *, apply_tanh):
    """LayerNorm(res + ctx@Wo^T + bo) -> FFN(relu, Conv1d k=1) -> LayerNorm(+residual) [-> tanh]."""

    def layer_norm(x, g, b):
        mean = jnp.mean(x, axis=-1, keepdims=True)
        var = jnp.mean((x - mean) ** 2, axis=-1, keepdims=True)
        return (x - mean) * lax.rsqrt(var + EPS) * g + b

    # MultiHeadAttention tail
    proj = (jnp.dot(ctx_ref[...], wo_ref[...], preferred_element_type=jnp.float32)
            + bo_ref[...])
    x1 = layer_norm(res_ref[...] + proj, g1_ref[...], be1_ref[...])

    # PositionalWiseFeedForward (Conv1d kernel=1 == pointwise matmul over channels)
    h = jnp.maximum(jnp.dot(x1, w1_ref[...], preferred_element_type=jnp.float32)
                    + b1_ref[...], 0.0)
    y = jnp.dot(h, w2_ref[...], preferred_element_type=jnp.float32) + b2_ref[...]
    out = layer_norm(x1 + y, g2_ref[...], be2_ref[...])

    if apply_tanh:                       # final torch.tanh fused into the last layer's kernel
        out = jnp.tanh(out)
    o_ref[...] = out


# ----------------------------- wrappers ------------------------------------

def fused_qkv(x2d, pe, wqkv_t, bqkv, *, batch, add_pe):
    n, d = x2d.shape
    d3 = wqkv_t.shape[1]
    return pl.pallas_call(
        functools.partial(qkv_kernel, batch=batch, add_pe=add_pe),
        out_shape=(jax.ShapeDtypeStruct((n, d), jnp.float32),
                   jax.ShapeDtypeStruct((n, d3), jnp.float32)),
    )(x2d, pe, wqkv_t, bqkv)


def fused_attention(qh, kh, vh):
    return pl.pallas_call(
        attn_kernel,
        out_shape=jax.ShapeDtypeStruct(qh.shape, jnp.float32),
    )(qh, kh, vh)


def fused_proj_ln_ffn(ctx2d, res2d, lp, *, apply_tanh):
    n, d = res2d.shape
    return pl.pallas_call(
        functools.partial(proj_ln_ffn_kernel, apply_tanh=apply_tanh),
        out_shape=jax.ShapeDtypeStruct((n, d), jnp.float32),
    )(ctx2d, res2d, lp["wo_t"], lp["bo"], lp["g1"], lp["beta1"],
      lp["w1_t"], lp["b1"], lp["w2_t"], lp["b2"], lp["g2"], lp["beta2"])


# ----------------------------- parameters -----------------------------------

def make_positional_encoding(d_model, max_seq_len):
    # Replica of PositionalEncoding.__init__ (before the pad row is prepended).
    pe = np.array([[pos / np.power(10000, 2.0 * (j // 2) / d_model)
                    for j in range(d_model)] for pos in range(max_seq_len)],
                  dtype=np.float64)
    pe[:, 0::2] = np.sin(pe[:, 0::2])
    pe[:, 1::2] = np.cos(pe[:, 1::2])
    # Embedding lookup in the torch module uses positions 1..L of the padded table,
    # which are exactly rows 0..L-1 of this unpadded table.
    return jnp.asarray(pe, dtype=jnp.float32)            # [max_seq_len, d_model]


def init_params(key, num_layers, model_dim, ffn_dim, max_seq_len):
    """Raw parameters in the PyTorch layout (nn.Linear / Conv1d weights are [out, in])."""
    params = {"pos_enc": make_positional_encoding(model_dim, max_seq_len), "layers": []}
    for i in range(num_layers):
        keys = jax.random.split(jax.random.fold_in(key, i), 12)

        def w(k, shape):
            return jax.random.normal(k, shape, jnp.float32) * 0.05

        layer = {
            "wq": w(keys[0], (model_dim, model_dim)), "bq": w(keys[1], (model_dim,)),
            "wk": w(keys[2], (model_dim, model_dim)), "bk": w(keys[3], (model_dim,)),
            "wv": w(keys[4], (model_dim, model_dim)), "bv": w(keys[5], (model_dim,)),
            "wo": w(keys[6], (model_dim, model_dim)), "bo": w(keys[7], (model_dim,)),
            "g1": jnp.ones((model_dim,), jnp.float32),
            "beta1": jnp.zeros((model_dim,), jnp.float32),
            # Conv1d(kernel=1) weights treated as [out, in]
            "w1": w(keys[8], (ffn_dim, model_dim)), "b1": w(keys[9], (ffn_dim,)),
            "w2": w(keys[10], (model_dim, ffn_dim)), "b2": w(keys[11], (model_dim,)),
            "g2": jnp.ones((model_dim,), jnp.float32),
            "beta2": jnp.zeros((model_dim,), jnp.float32),
        }
        params["layers"].append(layer)
    return params


def prepare_params(params, num_heads):
    """One-time weight prep: transpose + concatenate QKV and fold in the attention scale.

    scale replicates the torch expression `(key.size(-1) // num_heads) ** (-0.5)` exactly,
    integer division included (dph=8, H=4 -> 1/sqrt(2)).  softmax((s*q) k^T) == softmax(s*(q k^T)),
    so folding s into Wq/bq is exact.
    """
    prepared = {"pos_enc": params["pos_enc"], "layers": []}
    for l in params["layers"]:
        d = l["wq"].shape[0]
        ffn = l["w1"].shape[0]
        dph = d // num_heads
        scale = float((dph // num_heads) ** (-0.5))
        wqkv_t = jnp.concatenate([(l["wq"] * scale).T, l["wk"].T, l["wv"].T], axis=1)  # [D, 3D]
        bqkv = jnp.concatenate([l["bq"] * scale, l["bk"], l["bv"]]).reshape(1, 3 * d)
        prepared["layers"].append({
            "wqkv_t": wqkv_t, "bqkv": bqkv,
            "wo_t": l["wo"].T, "bo": l["bo"].reshape(1, d),
            "g1": l["g1"].reshape(1, d), "beta1": l["beta1"].reshape(1, d),
            "w1_t": l["w1"].T, "b1": l["b1"].reshape(1, ffn),
            "w2_t": l["w2"].T, "b2": l["b2"].reshape(1, d),
            "g2": l["g2"].reshape(1, d), "beta2": l["beta2"].reshape(1, d),
        })
    return prepared


# ----------------------------- model ----------------------------------------

@functools.partial(jax.jit, static_argnums=(2,))
def encoder_hidden_forward(x, prepared, num_heads):
    """x: [B, L, D].  Reproduces EncoderHidden.forward (dropout p=0 / eval semantics)."""
    B, L, D = x.shape
    H = num_heads
    dph = D // H
    n_layers = len(prepared["layers"])

    pe = prepared["pos_enc"][:L]                    # [L, D] rows for positions 1..L
    out2d = x.reshape(B * L, D)

    for i, lp in enumerate(prepared["layers"]):
        # Kernel A: (PE add for layer 0) + fused QKV projection.  res2d is the residual.
        res2d, qkv = fused_qkv(out2d, pe, lp["wqkv_t"], lp["bqkv"],
                               batch=B, add_pe=(i == 0))

        # PyTorch's raw .view(B*H, -1, dph) head split (row-major reshape, no transpose).
        q = qkv[:, :D].reshape(B * H, L, dph)
        k = qkv[:, D:2 * D].reshape(B * H, L, dph)
        v = qkv[:, 2 * D:].reshape(B * H, L, dph)

        # Kernel B: all heads / batches in one call.
        ctx = fused_attention(q, k, v).reshape(B * L, D)   # .view(B, -1, dph*H)

        # Kernel C: output proj + residual + LN + FFN + residual + LN (+ tanh on last layer).
        out2d = fused_proj_ln_ffn(ctx, res2d, lp, apply_tanh=(i == n_layers - 1))

    # TODO(synk): dropout layers have p=0.0 here (eval semantics) and are identity.
    return out2d.reshape(B, L, D)


# ----------------------------- main -----------------------------------------

if __name__ == "__main__":
    B, L = 2, 8
    MODEL_DIM, NUM_HEADS, FFN_DIM = 32, 4, 64
    MAX_SEQ_LEN, NUM_LAYERS = 16, 1

    key = jax.random.PRNGKey(0)
    k_x, k_p = jax.random.split(key)
    x = jax.random.normal(k_x, (B, L, MODEL_DIM), jnp.float32)

    raw_params = init_params(k_p, NUM_LAYERS, MODEL_DIM, FFN_DIM, MAX_SEQ_LEN)
    params = prepare_params(raw_params, NUM_HEADS)       # one-time weight transposes/concat

    out = encoder_hidden_forward(x, params, NUM_HEADS)
    out = jax.block_until_ready(out)
    assert out.shape == (B, L, MODEL_DIM)
    assert bool(jnp.all(jnp.isfinite(out)))
    print("KERNEL_OK")
</pallas_src>

<mosaic_0001>
module attributes {stable_mosaic.version = 11 : i64} {
  func.func @qkv_kernel(%arg0: memref<16x32xf32, #tpu.memory_space<vmem>>, %arg1: memref<8x32xf32, #tpu.memory_space<vmem>>, %arg2: memref<32x96xf32, #tpu.memory_space<vmem>>, %arg3: memref<1x96xf32, #tpu.memory_space<vmem>>, %arg4: memref<16x32xf32, #tpu.memory_space<vmem>>, %arg5: memref<16x96xf32, #tpu.memory_space<vmem>>) attributes {dimension_semantics = [], scalar_prefetch = 0 : i64, scratch_operands = 0 : i64, tpu.core_type = #tpu.core_type<tc>} {
    %c0 = arith.constant 0 : index
    %c0_0 = arith.constant 0 : index
    %0 = vector.load %arg0[%c0, %c0_0] : memref<16x32xf32, #tpu.memory_space<vmem>>, vector<16x32xf32>
    %c0_1 = arith.constant 0 : index
    %c0_2 = arith.constant 0 : index
    %1 = vector.load %arg1[%c0_1, %c0_2] : memref<8x32xf32, #tpu.memory_space<vmem>>, vector<8x32xf32>
    %2 = tpu.concatenate %1, %1 in 0 : vector<8x32xf32>, vector<8x32xf32> -> vector<16x32xf32>
    %3 = arith.addf %0, %2 : vector<16x32xf32>
    %c0_3 = arith.constant 0 : index
    %c0_4 = arith.constant 0 : index
    %4 = vector.load %arg4[%c0_3, %c0_4] : memref<16x32xf32, #tpu.memory_space<vmem>>, vector<16x32xf32>
    tpu.vector_store %arg4[%c0_3, %c0_4], %3 {strides = array<i32>} : memref<16x32xf32, #tpu.memory_space<vmem>>, vector<16x32xf32>,
    %c0_5 = arith.constant 0 : index
    %c0_6 = arith.constant 0 : index
    %5 = vector.load %arg2[%c0_5, %c0_6] : memref<32x96xf32, #tpu.memory_space<vmem>>, vector<32x96xf32>
    %cst = arith.constant dense<0.000000e+00> : vector<16x96xf32>
    %6 = tpu.matmul %3, %5, %cst {dimension_numbers = #tpu.dot_dimension_numbers<[1], [0], [0], [1], [0, 0, 1, 1], [], []>} : vector<16x32xf32>, vector<32x96xf32>, vector<16x96xf32> -> vector<16x96xf32>
    %c0_7 = arith.constant 0 : index
    %c0_8 = arith.constant 0 : index
    %7 = vector.load %arg3[%c0_7, %c0_8] : memref<1x96xf32, #tpu.memory_space<vmem>>, vector<1x96xf32>
    %8 = vector.broadcast %7 : vector<1x96xf32> to vector<16x96xf32>
    %9 = arith.addf %6, %8 : vector<16x96xf32>
    %c0_9 = arith.constant 0 : index
    %c0_10 = arith.constant 0 : index
    %10 = vector.load %arg5[%c0_9, %c0_10] : memref<16x96xf32, #tpu.memory_space<vmem>>, vector<16x96xf32>
    tpu.vector_store %arg5[%c0_9, %c0_10], %9 {strides = array<i32>} : memref<16x96xf32, #tpu.memory_space<vmem>>, vector<16x96xf32>,
    return
  }
}

module attributes {stable_mosaic.version = 11 : i64} {
  func.func @attn_kernel(%arg0: memref<8x8x8xf32, #tpu.memory_space<vmem>>, %arg1: memref<8x8x8xf32, #tpu.memory_space<vmem>>, %arg2: memref<8x8x8xf32, #tpu.memory_space<vmem>>, %arg3: memref<8x8x8xf32, #tpu.memory_space<vmem>>) attributes {dimension_semantics = [], scalar_prefetch = 0 : i64, scratch_operands = 0 : i64, tpu.core_type = #tpu.core_type<tc>} {
    %c0 = arith.constant 0 : index
    %c0_0 = arith.constant 0 : index
    %c0_1 = arith.constant 0 : index
    %0 = vector.load %arg0[%c0, %c0_0, %c0_1] : memref<8x8x8xf32, #tpu.memory_space<vmem>>, vector<8x8x8xf32>
    %c0_2 = arith.constant 0 : index
    %c0_3 = arith.constant 0 : index
    %c0_4 = arith.constant 0 : index
    %1 = vector.load %arg1[%c0_2, %c0_3, %c0_4] : memref<8x8x8xf32, #tpu.memory_space<vmem>>, vector<8x8x8xf32>
    %c0_5 = arith.constant 0 : index
    %c0_6 = arith.constant 0 : index
    %c0_7 = arith.constant 0 : index
    %2 = vector.load %arg2[%c0_5, %c0_6, %c0_7] : memref<8x8x8xf32, #tpu.memory_space<vmem>>, vector<8x8x8xf32>
    "tpu.trace_start"() <{level = 10 : i32, message = "gqd,gkd->gqk"}> : () -> ()
    %cst = arith.constant dense<0.000000e+00> : vector<8x8x8xf32>
    %3 = tpu.matmul %0, %1, %cst {dimension_numbers = #tpu.dot_dimension_numbers<[2], [2], [1], [1], [0, 0, 0, 1, 1, 1], [0], [0]>} : vector<8x8x8xf32>, vector<8x8x8xf32>, vector<8x8x8xf32> -> vector<8x8x8xf32>
    "tpu.trace_stop"() : () -> ()
    %cst_8 = arith.constant dense<0xFF800000> : vector<8x8xf32>
    %4 = vector.multi_reduction <maximumf>, %3, %cst_8 [2] : vector<8x8x8xf32> to vector<8x8xf32>
    %5 = vector.shape_cast %4 : vector<8x8xf32> to vector<8x8x1xf32>
    %6 = vector.broadcast %5 : vector<8x8x1xf32> to vector<8x8x8xf32>
    %7 = arith.subf %3, %6 : vector<8x8x8xf32>
    %8 = math.exp %7 : vector<8x8x8xf32>
    %cst_9 = arith.constant dense<0.000000e+00> : vector<8x8xf32>
    %9 = vector.multi_reduction <add>, %8, %cst_9 [2] : vector<8x8x8xf32> to vector<8x8xf32>
    %10 = vector.shape_cast %9 : vector<8x8xf32> to vector<8x8x1xf32>
    %11 = tpu.reciprocal %10 {approx = true} : vector<8x8x1xf32> -> vector<8x8x1xf32>
    %12 = vector.broadcast %11 : vector<8x8x1xf32> to vector<8x8x8xf32>
    %13 = arith.mulf %8, %12 : vector<8x8x8xf32>
    "tpu.trace_start"() <{level = 10 : i32, message = "gqk,gkd->gqd"}> : () -> ()
    %cst_10 = arith.constant dense<0.000000e+00> : vector<8x8x8xf32>
    %14 = tpu.matmul %13, %2, %cst_10 {dimension_numbers = #tpu.dot_dimension_numbers<[2], [1], [1], [2], [0, 0, 0, 1, 1, 2], [0], [0]>} : vector<8x8x8xf32>, vector<8x8x8xf32>, vector<8x8x8xf32> -> vector<8x8x8xf32>
    "tpu.trace_stop"() : () -> ()
    %c0_11 = arith.constant 0 : index
    %c0_12 = arith.constant 0 : index
    %c0_13 = arith.constant 0 : index
    %15 = vector.load %arg3[%c0_11, %c0_12, %c0_13] : memref<8x8x8xf32, #tpu.memory_space<vmem>>, vector<8x8x8xf32>
    tpu.vector_store %arg3[%c0_11, %c0_12, %c0_13], %14 {strides = array<i32>} : memref<8x8x8xf32, #tpu.memory_space<vmem>>, vector<8x8x8xf32>,
    return
  }
}

module attributes {stable_mosaic.version = 11 : i64} {
  func.func @proj_ln_ffn_kernel(%arg0: memref<16x32xf32, #tpu.memory_space<vmem>>, %arg1: memref<16x32xf32, #tpu.memory_space<vmem>>, %arg2: memref<32x32xf32, #tpu.memory_space<vmem>>, %arg3: memref<1x32xf32, #tpu.memory_space<vmem>>, %arg4: memref<1x32xf32, #tpu.memory_space<vmem>>, %arg5: memref<1x32xf32, #tpu.memory_space<vmem>>, %arg6: memref<32x64xf32, #tpu.memory_space<vmem>>, %arg7: memref<1x64xf32, #tpu.memory_space<vmem>>, %arg8: memref<64x32xf32, #tpu.memory_space<vmem>>, %arg9: memref<1x32xf32, #tpu.memory_space<vmem>>, %arg10: memref<1x32xf32, #tpu.memory_space<vmem>>, %arg11: memref<1x32xf32, #tpu.memory_space<vmem>>, %arg12: memref<16x32xf32, #tpu.memory_space<vmem>>) attributes {dimension_semantics = [], scalar_prefetch = 0 : i64, scratch_operands = 0 : i64, tpu.core_type = #tpu.core_type<tc>} {
    %c0 = arith.constant 0 : index
    %c0_0 = arith.constant 0 : index
    %0 = vector.load %arg0[%c0, %c0_0] : memref<16x32xf32, #tpu.memory_space<vmem>>, vector<16x32xf32>
    %c0_1 = arith.constant 0 : index
    %c0_2 = arith.constant 0 : index
    %1 = vector.load %arg2[%c0_1, %c0_2] : memref<32x32xf32, #tpu.memory_space<vmem>>, vector<32x32xf32>
    %cst = arith.constant dense<0.000000e+00> : vector<16x32xf32>
    %2 = tpu.matmul %0, %1, %cst {dimension_numbers = #tpu.dot_dimension_numbers<[1], [0], [0], [1], [0, 0, 1, 1], [], []>} : vector<16x32xf32>, vector<32x32xf32>, vector<16x32xf32> -> vector<16x32xf32>
    %c0_3 = arith.constant 0 : index
    %c0_4 = arith.constant 0 : index
    %3 = vector.load %arg3[%c0_3, %c0_4] : memref<1x32xf32, #tpu.memory_space<vmem>>, vector<1x32xf32>
    %4 = vector.broadcast %3 : vector<1x32xf32> to vector<16x32xf32>
    %5 = arith.addf %2, %4 : vector<16x32xf32>
    %c0_5 = arith.constant 0 : index
    %c0_6 = arith.constant 0 : index
    %6 = vector.load %arg1[%c0_5, %c0_6] : memref<16x32xf32, #tpu.memory_space<vmem>>, vector<16x32xf32>
    %7 = arith.addf %6, %5 : vector<16x32xf32>
    %c0_7 = arith.constant 0 : index
    %c0_8 = arith.constant 0 : index
    %8 = vector.load %arg4[%c0_7, %c0_8] : memref<1x32xf32, #tpu.memory_space<vmem>>, vector<1x32xf32>
    %c0_9 = arith.constant 0 : index
    %c0_10 = arith.constant 0 : index
    %9 = vector.load %arg5[%c0_9, %c0_10] : memref<1x32xf32, #tpu.memory_space<vmem>>, vector<1x32xf32>
    %cst_11 = arith.constant dense<0.000000e+00> : vector<16xf32>
    %10 = vector.multi_reduction <add>, %7, %cst_11 [1] : vector<16x32xf32> to vector<16xf32>
    %11 = vector.shape_cast %10 : vector<16xf32> to vector<16x1xf32>
    %cst_12 = arith.constant 3.200000e+01 : f32
    %12 = vector.broadcast %cst_12 : f32 to vector<16x1xf32>
    %13 = arith.divf %11, %12 : vector<16x1xf32>
    %14 = vector.broadcast %13 : vector<16x1xf32> to vector<16x32xf32>
    %15 = arith.subf %7, %14 : vector<16x32xf32>
    %16 = arith.mulf %15, %15 : vector<16x32xf32>
    %cst_13 = arith.constant dense<0.000000e+00> : vector<16xf32>
    %17 = vector.multi_reduction <add>, %16, %cst_13 [1] : vector<16x32xf32> to vector<16xf32>
    %18 = vector.shape_cast %17 : vector<16xf32> to vector<16x1xf32>
    %cst_14 = arith.constant 3.200000e+01 : f32
    %19 = vector.broadcast %cst_14 : f32 to vector<16x1xf32>
    %20 = arith.divf %18, %19 : vector<16x1xf32>
    %21 = vector.broadcast %13 : vector<16x1xf32> to vector<16x32xf32>
    %22 = arith.subf %7, %21 : vector<16x32xf32>
    %cst_15 = arith.constant 9.99999974E-6 : f32
    %23 = vector.broadcast %cst_15 : f32 to vector<16x1xf32>
    %24 = arith.addf %20, %23 : vector<16x1xf32>
    %25 = math.rsqrt %24 : vector<16x1xf32>
    %26 = vector.broadcast %25 : vector<16x1xf32> to vector<16x32xf32>
    %27 = arith.mulf %22, %26 : vector<16x32xf32>
    %28 = vector.broadcast %8 : vector<1x32xf32> to vector<16x32xf32>
    %29 = arith.mulf %27, %28 : vector<16x32xf32>
    %30 = vector.broadcast %9 : vector<1x32xf32> to vector<16x32xf32>
    %31 = arith.addf %29, %30 : vector<16x32xf32>
    %c0_16 = arith.constant 0 : index
    %c0_17 = arith.constant 0 : index
    %32 = vector.load %arg6[%c0_16, %c0_17] : memref<32x64xf32, #tpu.memory_space<vmem>>, vector<32x64xf32>
    %cst_18 = arith.constant dense<0.000000e+00> : vector<16x64xf32>
    %33 = tpu.matmul %31, %32, %cst_18 {dimension_numbers = #tpu.dot_dimension_numbers<[1], [0], [0], [1], [0, 0, 1, 1], [], []>} : vector<16x32xf32>, vector<32x64xf32>, vector<16x64xf32> -> vector<16x64xf32>
    %c0_19 = arith.constant 0 : index
    %c0_20 = arith.constant 0 : index
    %34 = vector.load %arg7[%c0_19, %c0_20] : memref<1x64xf32, #tpu.memory_space<vmem>>, vector<1x64xf32>
    %35 = vector.broadcast %34 : vector<1x64xf32> to vector<16x64xf32>
    %36 = arith.addf %33, %35 : vector<16x64xf32>
    %cst_21 = arith.constant 0.000000e+00 : f32
    %37 = vector.broadcast %cst_21 : f32 to vector<16x64xf32>
    %38 = arith.maximumf %36, %37 : vector<16x64xf32>
    %c0_22 = arith.constant 0 : index
    %c0_23 = arith.constant 0 : index
    %39 = vector.load %arg8[%c0_22, %c0_23] : memref<64x32xf32, #tpu.memory_space<vmem>>, vector<64x32xf32>
    %cst_24 = arith.constant dense<0.000000e+00> : vector<16x32xf32>
    %40 = tpu.matmul %38, %39, %cst_24 {dimension_numbers = #tpu.dot_dimension_numbers<[1], [0], [0], [1], [0, 0, 1, 1], [], []>} : vector<16x64xf32>, vector<64x32xf32>, vector<16x32xf32> -> vector<16x32xf32>
    %c0_25 = arith.constant 0 : index
    %c0_26 = arith.constant 0 : index
    %41 = vector.load %arg9[%c0_25, %c0_26] : memref<1x32xf32, #tpu.memory_space<vmem>>, vector<1x32xf32>
    %42 = vector.broadcast %41 : vector<1x32xf32> to vector<16x32xf32>
    %43 = arith.addf %40, %42 : vector<16x32xf32>
    %44 = arith.addf %31, %43 : vector<16x32xf32>
    %c0_27 = arith.constant 0 : index
    %c0_28 = arith.constant 0 : index
    %45 = vector.load %arg10[%c0_27, %c0_28] : memref<1x32xf32, #tpu.memory_space<vmem>>, vector<1x32xf32>
    %c0_29 = arith.constant 0 : index
    %c0_30 = arith.constant 0 : index
    %46 = vector.load %arg11[%c0_29, %c0_30] : memref<1x32xf32, #tpu.memory_space<vmem>>, vector<1x32xf32>
    %cst_31 = arith.constant dense<0.000000e+00> : vector<16xf32>
    %47 = vector.multi_reduction <add>, %44, %cst_31 [1] : vector<16x32xf32> to vector<16xf32>
    %48 = vector.shape_cast %47 : vector<16xf32> to vector<16x1xf32>
    %cst_32 = arith.constant 3.200000e+01 : f32
    %49 = vector.broadcast %cst_32 : f32 to vector<16x1xf32>
    %50 = arith.divf %48, %49 : vector<16x1xf32>
    %51 = vector.broadcast %50 : vector<16x1xf32> to vector<16x32xf32>
    %52 = arith.subf %44, %51 : vector<16x32xf32>
    %53 = arith.mulf %52, %52 : vector<16x32xf32>
    %cst_33 = arith.constant dense<0.000000e+00> : vector<16xf32>
    %54 = vector.multi_reduction <add>, %53, %cst_33 [1] : vector<16x32xf32> to vector<16xf32>
    %55 = vector.shape_cast %54 : vector<16xf32> to vector<16x1xf32>
    %cst_34 = arith.constant 3.200000e+01 : f32
    %56 = vector.broadcast %cst_34 : f32 to vector<16x1xf32>
    %57 = arith.divf %55, %56 : vector<16x1xf32>
    %58 = vector.broadcast %50 : vector<16x1xf32> to vector<16x32xf32>
    %59 = arith.subf %44, %58 : vector<16x32xf32>
    %cst_35 = arith.constant 9.99999974E-6 : f32
    %60 = vector.broadcast %cst_35 : f32 to vector<16x1xf32>
    %61 = arith.addf %57, %60 : vector<16x1xf32>
    %62 = math.rsqrt %61 : vector<16x1xf32>
    %63 = vector.broadcast %62 : vector<16x1xf32> to vector<16x32xf32>
    %64 = arith.mulf %59, %63 : vector<16x32xf32>
    %65 = vector.broadcast %45 : vector<1x32xf32> to vector<16x32xf32>
    %66 = arith.mulf %64, %65 : vector<16x32xf32>
    %67 = vector.broadcast %46 : vector<1x32xf32> to vector<16x32xf32>
    %68 = arith.addf %66, %67 : vector<16x32xf32>
    %69 = math.tanh %68 : vector<16x32xf32>
    %c0_36 = arith.constant 0 : index
    %c0_37 = arith.constant 0 : index
    %70 = vector.load %arg12[%c0_36, %c0_37] : memref<16x32xf32, #tpu.memory_space<vmem>>, vector<16x32xf32>
    tpu.vector_store %arg12[%c0_36, %c0_37], %69 {strides = array<i32>} : memref<16x32xf32, #tpu.memory_space<vmem>>, vector<16x32xf32>,
    return
  }
}

</mosaic_0001>

<bundles_post_ra>
// kernel: encoder_hidden_forward.3
= control target key start
LH: loop header
LB: loop body
LE: loop exit
PB: predicated region body
PF: predicated region fallthrough
CT: control target
= control target key end

     0   :  { %11 = vsyncpa [#allocation3], 0  ;;  %s200_s18 = smov [#allocation2]   ;;  %s275_s0 = inlined_call_operand.hbm [shape: f32[16,32], index: 0, kind: input, shape index: {}]   ;;  %s276_s1 = inlined_call_operand.vmem [shape: f32[8,32], index: 1, kind: input, shape index: {}]   ;;  %s277_s2 = inlined_call_operand.vmem [shape: f32[32,96], index: 2, kind: input, shape index: {}]   ;;  %s278_s3 = inlined_call_operand.vmem [shape: f32[1,96], index: 3, kind: input, shape index: {}]   ;;  %s279_s4 = inlined_call_operand.vmem [shape: f32[16,32], index: 4, kind: output, shape index: {0}]   ;;  %s280_s5 = inlined_call_operand.vmem [shape: f32[16,96], index: 5, kind: output, shape index: {1}]  }
   0x1   :  { %s17_s19 = sshll.u32 %s200_s18, 4  ;;  %s176_s22 = scalar_lea.hbm %s275_s0, 256  ;;  %s18_s19 = int_to_ptr.vmem [resolvable:$true] %s17_s19 }
   0x2   :  { %p177_p0 = scmp.ne.s32.totalorder %s275_s0, %s176_s22  ;;  %p180_p1 = scmp.lt.u32.totalorder %s176_s22, %s275_s0 }
   0x4   :  { %p182_p2 = pnand %p180_p1, %p177_p0 }
   0x6   :  { %185 = shalt.err (!%p182_p2)
}
   0x7   :  { %s186_s27 = scalar_lea.vmem %s18_s19, 256  ;;  %p191_p4 = scmp.lt.s32.totalorder %s18_s19, %s18_s19 }
   0x8   :  { %p187_p3 = scmp.ne.s32.totalorder %s18_s19, %s186_s27  ;;  %p192_p5 = scmp.lt.s32.totalorder %s186_s27, %s186_s27 }
   0xa   :  { %p193_p6 = por %p192_p5, %p191_p4 }
   0xc   :  { %p194_p7 = pnand %p193_p6, %p187_p3 }
   0xe   :  { %197 = shalt.err (!%p194_p7)
}
   0xf   :  { %s201_s28 = smov 128   ;;  %s202_s29 = smov 8  }
  0x10   :  { %23 = dma.hbm_to_vmem [thread:$0]  %s275_s0, 256, %s18_s19, [#allocation3], %s201_s28, %s201_s28, %s202_s29  }
  0x11   :  { %198 = dma.done.wait [#allocation3], 256  }
  0x12   :  { %199 = vsyncadd [#allocation3], 4294967040  ;;  %v41_v0 = vld [vmem:[%s277_s2] sm:$0xff]  ;;  %v42_v1 = vld [vmem:[%s277_s2 + $0x8] sm:$0xff]  ;;  %vm38_vm0 = vcmask 261120   ;;  %vm133_vm1 = vcmask 785408  }
  0x13   :  { %v43_v2 = vld [vmem:[%s277_s2 + $0x10] sm:$0xff]  ;;  %v165_v3 = vpack.c.bf16 %v42_v1, %v41_v0  ;;  %v44_v4 = vld [vmem:[%s277_s2 + $0x18] sm:$0xff]  ;;  %v33_v5 = vld [vmem:[#allocation2] sm:$0xff] }
  0x14   :  { %v34_v6 = vld [vmem:[#allocation2 + $0x8] sm:$0xff]  ;;  %v169_v7 = vpack.c.bf16 %v44_v4, %v43_v2  ;;  %v35_v8 = vld [vmem:[%s276_s1] sm:$0xff] }
  0x15   :  { %166 = vmatprep.subr.bf16.mxu0 %v165_v3  ;;  %v36_v9 = vadd.f32 %v35_v8, %v33_v5  ;;  %v37_v10 = vadd.f32 %v35_v8, %v34_v6  ;;  %v145_v11 = vld [vmem:[%s278_s3] ss:$0 sm:$0xff] }
  0x16   :  { %168 = vmatpush3.bf16.msra.mxu0 %v165_v3 }
  0x17   :  { %170 = vmatprep.subr.bf16.mxu0 %v169_v7  ;;  %39 = vst.msk [vmem:[%s279_s4] sm:$0xff] %vm38_vm0, %v36_v9  ;;  %40 = vst.msk [vmem:[%s279_s4 + $0x8] sm:$0xff] %vm38_vm0, %v37_v10  ;;  %162 = vmatprep.mubr.msk.f32.mxu0 %vm38_vm0, %v36_v9 }
  0x1a   :  { %172 = vmatpush3.bf16.msra.mxu0 %v169_v7 }
  0x1d   :  { %163 = vmatmul.mubr.msk.f32.vlgmr.msra.gmra.mrb[0].mxu0 %vm38_vm0, %v37_v10 }
  0xf0   :  { %v164_v12 = vpop.f32.mrb[0].mxu0 }
  0xf1   :  { %v130_v13 = vadd.f32 %v164_v12, %v145_v11  ;;  %v124_v14 = vpop.f32.mrb[1].mxu0 }
  0xf2   :  { %v125_v15 = vadd.f32 %v145_v11, %v124_v14 }
  0xf3   :  { %135 = vst.msk [vmem:[%s280_s5 + $0x8] sm:$0xff] %vm133_vm1, %v130_v13 }
  0xf4   :  { %134 = vst.msk [vmem:[%s280_s5] sm:$0xff] %vm133_vm1, %v125_v15 }
  0xf5   :  { %144 = vsyncpa [#allocation3], 1 }

// kernel: encoder_hidden_forward.5
= control target key start
LH: loop header
LB: loop body
LE: loop exit
PB: predicated region body
PF: predicated region fallthrough
CT: control target
= control target key end

     0   :  { %vm55_vm0 = vcmask 261120   ;;  %s765_s0 = inlined_call_operand.vmem [shape: f32[16,32], index: 0, kind: input, shape index: {}]   ;;  %s766_s1 = inlined_call_operand.vmem [shape: f32[16,32], index: 1, kind: input, shape index: {}]   ;;  %s767_s2 = inlined_call_operand.vmem [shape: f32[32,32], index: 2, kind: input, shape index: {}]   ;;  %s768_s3 = inlined_call_operand.vmem [shape: f32[1,32], index: 3, kind: input, shape index: {}]   ;;  %s769_s4 = inlined_call_operand.vmem [shape: f32[1,32], index: 4, kind: input, shape index: {}]   ;;  %s770_s5 = inlined_call_operand.vmem [shape: f32[1,32], index: 5, kind: input, shape index: {}]   ;;  %s771_s6 = inlined_call_operand.vmem [shape: f32[32,64], index: 6, kind: input, shape index: {}]   ;;  %s772_s7 = inlined_call_operand.vmem [shape: f32[1,64], index: 7, kind: input, shape index: {}]   ;;  %s773_s8 = inlined_call_operand.vmem [shape: f32[64,32], index: 8, kind: input, shape index: {}]   ;;  %s774_s9 = inlined_call_operand.vmem [shape: f32[1,32], index: 9, kind: input, shape index: {}]   ;;  %s775_s10 = inlined_call_operand.vmem [shape: f32[1,32], index: 10, kind: input, shape index: {}]   ;;  %s776_s11 = inlined_call_operand.vmem [shape: f32[1,32], index: 11, kind: input, shape index: {}]   ;;  %s777_s12 = inlined_call_operand.hbm [shape: f32[16,32], index: 12, kind: output, shape index: {}]  }
   0x1   :  { %v44_v0 = vld [vmem:[%s767_s2] sm:$0xff]  ;;  %v45_v1 = vld [vmem:[%s767_s2 + $0x8] sm:$0xff]  ;;  %v46_v2 = vld [vmem:[%s767_s2 + $0x10] sm:$0xff] }
   0x2   :  { %v519_v3 = vpack.c.bf16 %v45_v1, %v44_v0  ;;  %v47_v4 = vld [vmem:[%s767_s2 + $0x18] sm:$0xff]  ;;  %v42_v5 = vld [vmem:[%s765_s0] sm:$0xff] }
   0x3   :  { %v523_v6 = vpack.c.bf16 %v47_v4, %v46_v2  ;;  %486 = vmatprep.mubr.msk.f32.mxu1 %vm55_vm0, %v42_v5 }
   0x4   :  { %17 = vsyncpa [#allocation3], 0  ;;  %520 = vmatprep.subr.bf16.mxu1 %v519_v3  ;;  %v43_v7 = vld [vmem:[%s765_s0 + $0x8] sm:$0xff]  ;;  %v443_v8 = vld [vmem:[%s768_s3] ss:$0 sm:$0xff]  ;;  %vm295_vm1 = vcmask 523264  }
   0x5   :  { %522 = vmatpush3.bf16.msra.mxu1 %v519_v3  ;;  %v137_v11 = vld [vmem:[%s766_s1] sm:$0xff]  ;;  %v138_v14 = vld [vmem:[%s766_s1 + $0x8] sm:$0xff]  ;;  %v188_v32 = vld [vmem:[%s771_s6 + $0x10] sm:$0xff]  ;;  %s590_s25 = smov [#allocation2]  }
   0x6   :  { %524 = vmatprep.subr.bf16.mxu1 %v523_v6  ;;  %v186_v29 = vld [vmem:[%s771_s6] sm:$0xff]  ;;  %v187_v30 = vld [vmem:[%s771_s6 + $0x8] sm:$0xff]  ;;  %v189_v33 = vld [vmem:[%s771_s6 + $0x18] sm:$0xff]  ;;  %s432_s26 = sshll.u32 %s590_s25, 4  ;;  %s433_s26 = int_to_ptr.vmem [resolvable:$true] %s432_s26 }
   0x7   :  { %v527_v31 = vpack.c.bf16 %v187_v30, %v186_v29  ;;  %v531_v34 = vpack.c.bf16 %v189_v33, %v188_v32  ;;  %v280_v35 = vld [vmem:[%s773_s8] sm:$0xff]  ;;  %v281_v36 = vld [vmem:[%s773_s8 + $0x8] sm:$0xff]  ;;  %v282_v37 = vld [vmem:[%s773_s8 + $0x10] sm:$0xff]  ;;  %p571_p1 = scmp.lt.s32.totalorder %s433_s26, %s433_s26 }
   0x8   :  { %v535_v38 = vpack.c.bf16 %v281_v36, %v280_v35  ;;  %v283_v39 = vld [vmem:[%s773_s8 + $0x18] sm:$0xff]  ;;  %v284_v41 = vld [vmem:[%s773_s8 + $0x20] sm:$0xff]  ;;  %v285_v42 = vld [vmem:[%s773_s8 + $0x28] sm:$0xff] }
   0x9   :  { %526 = vmatpush3.bf16.msra.mxu1 %v523_v6  ;;  %v539_v40 = vpack.c.bf16 %v283_v39, %v282_v37  ;;  %v543_v43 = vpack.c.bf16 %v285_v42, %v284_v41  ;;  %v446_v51 = vld [vmem:[%s769_s4] ss:$0 sm:$0xff]  ;;  %v286_v60 = vld [vmem:[%s773_s8 + $0x30] sm:$0xff]  ;;  %v287_v61 = vld [vmem:[%s773_s8 + $0x38] sm:$0xff] }
   0xa   :  { %528 = vmatprep.subr.bf16.mxu1 %v527_v31  ;;  %536 = vmatprep.subr.bf16.mxu0 %v535_v38  ;;  %v447_v53 = vld [vmem:[%s770_s5] ss:$0 sm:$0xff]  ;;  %v547_v62 = vpack.c.bf16 %v287_v61, %v286_v60 }
   0xb   :  { %538 = vmatpush3.bf16.msra.mxu0 %v535_v38  ;;  %v448_v63 = vld [vmem:[%s772_s7] ss:$0 sm:$0xff] }
   0xc   :  { %487 = vmatmul.mubr.msk.f32.vlgmr.msra.gmra.mrb[0].mxu1 %vm55_vm0, %v43_v7  ;;  %540 = vmatprep.subr.bf16.mxu0 %v539_v40  ;;  %v451_v6 = vld [vmem:[%s774_s9] ss:$0 sm:$0xff] }
   0xd   :  { %530 = vmatpush3.bf16.msra.mxu1 %v527_v31  ;;  %v454_v32 = vld [vmem:[%s775_s10] ss:$0 sm:$0xff]  ;;  %s566_s10 = scalar_lea.vmem %s433_s26, 256 }
   0xe   :  { %532 = vmatprep.subr.bf16.mxu1 %v531_v34  ;;  %v455_v35 = vld [vmem:[%s776_s11] ss:$0 sm:$0xff]  ;;  %p567_p0 = scmp.ne.s32.totalorder %s433_s26, %s566_s10  ;;  %p572_p2 = scmp.lt.s32.totalorder %s566_s10, %s566_s10 }
   0xf   :  { %542 = vmatpush3.bf16.msra.mxu0 %v539_v40 }
  0x10   :  { %544 = vmatprep.subr.bf16.mxu0 %v543_v43  ;;  %p573_p3 = por %p572_p2, %p571_p1 }
  0x11   :  { %534 = vmatpush3.bf16.msra.mxu1 %v531_v34 }
  0x12   :  { %p574_p4 = pnand %p573_p3, %p567_p0 }
  0x13   :  { %546 = vmatpush3.bf16.msra.mxu0 %v543_v43 }
  0x14   :  { %548 = vmatprep.subr.bf16.mxu0 %v547_v62 }
  0x17   :  { %550 = vmatpush3.bf16.msra.mxu0 %v547_v62 }
  0xdf   :  { %v488_v9 = vpop.f32.mrb[0].mxu1 }
  0xe0   :  { %v128_v10 = vpop.f32.mrb[1].mxu1  ;;  %v134_v12 = vadd.f32 %v488_v9, %v443_v8 }
  0xe1   :  { %v129_v13 = vadd.f32 %v443_v8, %v128_v10 }
  0xe2   :  { %v140_v17 = vadd.f32 %v138_v14, %v134_v12 }
  0xe3   :  { %v139_v15 = vadd.f32 %v137_v11, %v129_v13 }
  0xe4   :  { %v146_v18 = vsel %vm55_vm0, %v140_v17, 0.0 }
  0xe5   :  { %v143_v16 = vsel %vm55_vm0, %v139_v15, 0.0 }
  0xe6   :  { %144 = vadd.xlane.f32.xlu0 %v143_v16 }
  0xea   :  { %147 = vadd.xlane.f32.xlu0 %v146_v18 }
 0x173   :  { %v145_v19 = vpop.xlane.xlu0 %144 }
 0x174   :  { %v150_v20 = vmul.f32 0.03125, %v145_v19 }
 0x176   :  { %v152_v21 = vsub.f32 %v139_v15, %v150_v20 }
 0x177   :  { %v148_v22 = vpop.xlane.xlu0 %147 }
 0x178   :  { %v151_v23 = vmul.f32 0.03125, %v148_v22  ;;  %v154_v24 = vmul.f32 %v152_v21, %v152_v21 }
 0x17a   :  { %v153_v25 = vsub.f32 %v140_v17, %v151_v23  ;;  %v156_v26 = vsel %vm55_vm0, %v154_v24, 0.0 }
 0x17b   :  { %157 = vadd.xlane.f32.xlu1 %v156_v26 }
 0x17c   :  { %v155_v27 = vmul.f32 %v153_v25, %v153_v25 }
 0x17e   :  { %v159_v28 = vsel %vm55_vm0, %v155_v27, 0.0 }
 0x17f   :  { %160 = vadd.xlane.f32.xlu1 %v159_v28 }
 0x208   :  { %v158_v44 = vpop.xlane.xlu1 %157 }
 0x209   :  { %v162_v45 = vmul.f32 0.03125, %v158_v44 }
 0x20b   :  { %v164_v46 = vadd.f32 1e-05, %v162_v45 }
 0x20c   :  { %v161_v47 = vpop.xlane.xlu1 %160 }
 0x20d   :  { %554 = vrsqrt.f32 %v164_v46  ;;  %v163_v48 = vmul.f32 0.03125, %v161_v47 }
 0x20f   :  { %v165_v49 = vadd.f32 1e-05, %v163_v48 }
 0x211   :  { %556 = vrsqrt.f32 %v165_v49 }
 0x217   :  { %v555_v50 = vpop.eup %554 }
 0x218   :  { %v168_v52 = vmul.f32 %v555_v50, %v152_v21 }
 0x21a   :  { %v176_v54 = vmul.f32 %v446_v51, %v168_v52 }
 0x21b   :  { %v557_v55 = vpop.eup %556 }
 0x21c   :  { %v169_v56 = vmul.f32 %v557_v55, %v153_v25  ;;  %v184_v57 = vadd.f32 %v447_v53, %v176_v54 }
 0x21e   :  { %v177_v58 = vmul.f32 %v446_v51, %v169_v56  ;;  %497 = vmatprep.mubr.msk.f32.mxu1 %vm55_vm0, %v184_v57 }
 0x220   :  { %v185_v59 = vadd.f32 %v447_v53, %v177_v58 }
 0x222   :  { %498 = vmatmul.mubr.msk.f32.vlgmr.msra.gmra.mrb[2].mxu1 %vm55_vm0, %v185_v59 }
 0x2f5   :  { %v499_v0 = vpop.f32.mrb[2].mxu1 }
 0x2f6   :  { %v275_v1 = vadd.f32 %v499_v0, %v448_v63  ;;  %v269_v2 = vpop.f32.mrb[3].mxu1 }
 0x2f7   :  { %v270_v3 = vadd.f32 %v448_v63, %v269_v2 }
 0x2f8   :  { %v279_v5 = vmax.f32 %v275_v1, 0.0 }
 0x2f9   :  { %v278_v4 = vmax.f32 %v270_v3, 0.0 }
 0x2fb   :  { %516 = vmatprep.mubr.msk.f32.mxu0 %vm295_vm1, %v278_v4 }
 0x2fc   :  { %517 = vmatmul.mubr.msk.f32.vlgmr.msra.gmra.mrb[0].mxu0 %vm295_vm1, %v279_v5 }
 0x3cf   :  { %v518_v7 = vpop.f32.mrb[0].mxu0 }
 0x3d0   :  { %v374_v8 = vadd.f32 %v518_v7, %v451_v6  ;;  %v368_v9 = vpop.f32.mrb[1].mxu0 }
 0x3d1   :  { %v369_v10 = vadd.f32 %v451_v6, %v368_v9 }
 0x3d2   :  { %v378_v11 = vadd.f32 %v374_v8, %v185_v59 }
 0x3d3   :  { %v377_v12 = vadd.f32 %v369_v10, %v184_v57 }
 0x3d4   :  { %v384_v13 = vsel %vm55_vm0, %v378_v11, 0.0 }
 0x3d5   :  { %385 = vadd.xlane.f32.xlu1 %v384_v13  ;;  %v381_v14 = vsel %vm55_vm0, %v377_v12, 0.0 }
 0x3d6   :  { %382 = vadd.xlane.f32.xlu0 %v381_v14 }
 0x462   :  { %v386_v15 = vpop.xlane.xlu1 %385 }
 0x463   :  { %v388_v16 = vmul.f32 0.03125, %v386_v15  ;;  %v383_v17 = vpop.xlane.xlu0 %382 }
 0x464   :  { %v387_v18 = vmul.f32 0.03125, %v383_v17 }
 0x465   :  { %v390_v19 = vsub.f32 %v378_v11, %v388_v16 }
 0x466   :  { %v389_v20 = vsub.f32 %v377_v12, %v387_v18 }
 0x467   :  { %v392_v21 = vmul.f32 %v390_v19, %v390_v19 }
 0x468   :  { %v391_v22 = vmul.f32 %v389_v20, %v389_v20 }
 0x469   :  { %v396_v23 = vsel %vm55_vm0, %v392_v21, 0.0 }
 0x46a   :  { %397 = vadd.xlane.f32.xlu1 %v396_v23  ;;  %v393_v24 = vsel %vm55_vm0, %v391_v22, 0.0 }
 0x46b   :  { %394 = vadd.xlane.f32.xlu0 %v393_v24 }
 0x4f7   :  { %v398_v25 = vpop.xlane.xlu1 %397 }
 0x4f8   :  { %v400_v26 = vmul.f32 0.03125, %v398_v25  ;;  %v395_v27 = vpop.xlane.xlu0 %394 }
 0x4f9   :  { %v399_v28 = vmul.f32 0.03125, %v395_v27 }
 0x4fa   :  { %v402_v29 = vadd.f32 1e-05, %v400_v26 }
 0x4fb   :  { %v401_v30 = vadd.f32 1e-05, %v399_v28 }
 0x4fc   :  { %558 = vrsqrt.f32 %v402_v29 }
 0x4fd   :  { %560 = vrsqrt.f32 %v401_v30 }
 0x506   :  { %v559_v31 = vpop.eup %558 }
 0x507   :  { %v561_v33 = vpop.eup %560  ;;  %v406_v34 = vmul.f32 %v559_v31, %v390_v19 }
 0x508   :  { %v405_v36 = vmul.f32 %v561_v33, %v389_v20 }
 0x509   :  { %v414_v37 = vmul.f32 %v454_v32, %v406_v34 }
 0x50a   :  { %v413_v38 = vmul.f32 %v454_v32, %v405_v36 }
 0x50b   :  { %v422_v39 = vadd.f32 %v455_v35, %v414_v37 }
 0x50c   :  { %v421_v40 = vadd.f32 %v455_v35, %v413_v38 }
 0x50d   :  { %562 = vtanh.f32 %v422_v39 }
 0x50e   :  { %564 = vtanh.f32 %v421_v40 }
 0x517   :  { %v563_v41 = vpop.eup %562 }
 0x518   :  { %v565_v42 = vpop.eup %564  ;;  %426 = vst.msk [vmem:[#allocation2 + $0x8] sm:$0xff] %vm55_vm0, %v563_v41 }
 0x519   :  { %425 = vst.msk [vmem:[#allocation2] sm:$0xff] %vm55_vm0, %v565_v42 }
 0x51a   :  { %577 = shalt.err (!%p574_p4)
}
 0x51b   :  { %s578_s28 = scalar_lea.hbm %s777_s12, 256 }
 0x51c   :  { %p579_p5 = scmp.ne.s32.totalorder %s777_s12, %s578_s28  ;;  %p582_p6 = scmp.lt.u32.totalorder %s578_s28, %s777_s12 }
 0x51e   :  { %p584_p7 = pnand %p582_p6, %p579_p5 }
 0x520   :  { %587 = shalt.err (!%p584_p7)
}
 0x521   :  { %s591_s6 = smov 128   ;;  %s592_s15 = smov 8  }
 0x522   :  { %438 = dma.vmem_to_hbm [thread:$0]  %s433_s26, 256, %s777_s12, [#allocation3], %s591_s6, %s591_s6, %s592_s15  }
 0x523   :  { %588 = dma.done.wait [#allocation3], 256  }
 0x524   :  { %589 = vsyncadd [#allocation3], 4294967040 }
 0x525   :  { %442 = vsyncpa [#allocation3], 1 }

// kernel: encoder_hidden_forward.4
= control target key start
LH: loop header
LB: loop body
LE: loop exit
PB: predicated region body
PF: predicated region fallthrough
CT: control target
= control target key end

     0   :  { %vm38_vm0 = vcmask 64512   ;;  %v1501_v0 = vmov 0.0   ;;  %vm1502_vm1 = vmmov 0   ;;  %s1727_s1 = inlined_call_operand.vmem [shape: f32[8,8,8], index: 1, kind: input, shape index: {}]   ;;  %s1728_s0 = inlined_call_operand.vmem [shape: f32[8,8,8], index: 0, kind: input, shape index: {}]   ;;  %s1729_s2 = inlined_call_operand.vmem [shape: f32[8,8,8], index: 2, kind: input, shape index: {}]   ;;  %s1730_s3 = inlined_call_operand.vmem [shape: f32[8,8,8], index: 3, kind: output, shape index: {}]  }
   0x1   :  { %1387 = vmatprep.subr.mxu0 %v1501_v0  ;;  %v22_v1 = vld [vmem:[%s1727_s1] sm:$0xff]  ;;  %1389 = vmatprep.mubr.msk.f32.mxu0 %vm1502_vm1, %v1501_v0  ;;  %v23_v2 = vld [vmem:[%s1727_s1 + $0x8] sm:$0xff]  ;;  %v24_v4 = vld [vmem:[%s1727_s1 + $0x10] sm:$0xff] }
   0x2   :  { %1388 = vmatpush3.xpose.msk.msra.mxu0 %vm38_vm0, %v22_v1  ;;  %v14_v3 = vld [vmem:[%s1728_s0] sm:$0xff]  ;;  %1392 = vmatprep.subr.mxu1 %v1501_v0  ;;  %v15_v5 = vld [vmem:[%s1728_s0 + $0x8] sm:$0xff]  ;;  %v25_v6 = vld [vmem:[%s1727_s1 + $0x18] sm:$0xff] }
   0x3   :  { %1397 = vmatprep.subr.mxu0 %v1501_v0  ;;  %1393 = vmatpush3.xpose.msk.msra.mxu1 %vm38_vm0, %v23_v2  ;;  %v16_v7 = vld [vmem:[%s1728_s0 + $0x10] sm:$0xff]  ;;  %v26_v8 = vld [vmem:[%s1727_s1 + $0x20] sm:$0xff]  ;;  %v17_v9 = vld [vmem:[%s1728_s0 + $0x18] sm:$0xff] }
   0x4   :  { %1394 = vmatprep.mubr.msk.f32.mxu1 %vm1502_vm1, %v1501_v0  ;;  %1402 = vmatprep.subr.mxu1 %v1501_v0  ;;  %v27_v10 = vld [vmem:[%s1727_s1 + $0x28] sm:$0xff]  ;;  %v18_v11 = vld [vmem:[%s1728_s0 + $0x20] sm:$0xff]  ;;  %v28_v12 = vld [vmem:[%s1727_s1 + $0x30] sm:$0xff] }
   0x5   :  { %1390 = vmatmul.mubr.msk.f32.vlgmr.msra.gmra.mrb[0].mxu0 %vm38_vm0, %v14_v3  ;;  %v19_v13 = vld [vmem:[%s1728_s0 + $0x28] sm:$0xff]  ;;  %v29_v14 = vld [vmem:[%s1727_s1 + $0x38] sm:$0xff]  ;;  %v20_v15 = vld [vmem:[%s1728_s0 + $0x30] sm:$0xff] }
   0x6   :  { %1398 = vmatpush3.xpose.msk.msra.mxu0 %vm38_vm0, %v24_v4  ;;  %1399 = vmatprep.mubr.msk.f32.mxu0 %vm1502_vm1, %v1501_v0  ;;  %v21_v16 = vld [vmem:[%s1728_s0 + $0x38] sm:$0xff] }
   0x7   :  { %1395 = vmatmul.mubr.msk.f32.vlgmr.msra.gmra.mrb[0].mxu1 %vm38_vm0, %v15_v5  ;;  %1407 = vmatprep.subr.mxu0 %v1501_v0 }
   0x8   :  { %1403 = vmatpush3.xpose.msk.msra.mxu1 %vm38_vm0, %v25_v6  ;;  %1404 = vmatprep.mubr.msk.f32.mxu1 %vm1502_vm1, %v1501_v0 }
   0x9   :  { %1400 = vmatmul.mubr.msk.f32.vlgmr.msra.gmra.mrb[2].mxu0 %vm38_vm0, %v16_v7  ;;  %1412 = vmatprep.subr.mxu1 %v1501_v0 }
   0xa   :  { %1408 = vmatpush3.xpose.msk.msra.mxu0 %vm38_vm0, %v26_v8  ;;  %1409 = vmatprep.mubr.msk.f32.mxu0 %vm1502_vm1, %v1501_v0 }
   0xb   :  { %1405 = vmatmul.mubr.msk.f32.vlgmr.msra.gmra.mrb[2].mxu1 %vm38_vm0, %v17_v9  ;;  %1417 = vmatprep.subr.mxu0 %v1501_v0 }
   0xc   :  { %1413 = vmatpush3.xpose.msk.msra.mxu1 %vm38_vm0, %v27_v10  ;;  %1414 = vmatprep.mubr.msk.f32.mxu1 %vm1502_vm1, %v1501_v0 }
   0xd   :  { %1410 = vmatmul.mubr.msk.f32.vlgmr.msra.gmra.mrb[4].mxu0 %vm38_vm0, %v18_v11  ;;  %1422 = vmatprep.subr.mxu1 %v1501_v0 }
   0xe   :  { %1418 = vmatpush3.xpose.msk.msra.mxu0 %vm38_vm0, %v28_v12  ;;  %1419 = vmatprep.mubr.msk.f32.mxu0 %vm1502_vm1, %v1501_v0 }
   0xf   :  { %1415 = vmatmul.mubr.msk.f32.vlgmr.msra.gmra.mrb[4].mxu1 %vm38_vm0, %v19_v13  ;;  %1427 = vmatprep.subr.mxu0 %v1501_v0 }
  0x10   :  { %1423 = vmatpush3.xpose.msk.msra.mxu1 %vm38_vm0, %v29_v14  ;;  %1424 = vmatprep.mubr.msk.f32.mxu1 %vm1502_vm1, %v1501_v0 }
  0x11   :  { %1420 = vmatmul.mubr.msk.f32.vlgmr.msra.gmra.mrb[6].mxu0 %vm38_vm0, %v20_v15  ;;  %1432 = vmatprep.subr.mxu1 %v1501_v0 }
  0x12   :  { %1429 = vmatprep.mubr.msk.f32.mxu0 %vm1502_vm1, %v1501_v0 }
  0x13   :  { %1425 = vmatmul.mubr.msk.f32.vlgmr.msra.gmra.mrb[6].mxu1 %vm38_vm0, %v21_v16 }
  0x14   :  { %1434 = vmatprep.mubr.msk.f32.mxu1 %vm1502_vm1, %v1501_v0 }
  0xd8   :  { %v111_v17 = vpop.f32.mrb[0].mxu0 }
  0xd9   :  { %v1391_v18 = vpop.f32.mrb[1].mxu0  ;;  %v647_v19 = vsel %vm38_vm0, %v111_v17, -inf }
  0xda   :  { %648 = vmax.xlane.f32.xlu0 %v647_v19  ;;  %v187_v20 = vpop.f32.mrb[0].mxu1  ;;  %v30_v18 = vld [vmem:[%s1729_s2] sm:$0xff]  ;;  %v31_v19 = vld [vmem:[%s1729_s2 + $0x8] sm:$0xff] }
  0xdb   :  { %v1396_v21 = vpop.f32.mrb[1].mxu1  ;;  %v650_v22 = vsel %vm38_vm0, %v187_v20, -inf  ;;  %1428 = vmatpush3.msra.mxu0 %v30_v18  ;;  %1433 = vmatpush3.msra.mxu1 %v31_v19 }
  0xdc   :  { %v263_v23 = vpop.f32.mrb[2].mxu0  ;;  %1437 = vmatprep.subr.mxu0 %v1501_v0  ;;  %1442 = vmatprep.subr.mxu1 %v1501_v0 }
  0xdd   :  { %v1401_v24 = vpop.f32.mrb[3].mxu0  ;;  %v653_v25 = vsel %vm38_vm0, %v263_v23, -inf }
  0xde   :  { %651 = vmax.xlane.f32.xlu0 %v650_v22  ;;  %654 = vmax.xlane.f32.xlu1 %v653_v25  ;;  %v339_v26 = vpop.f32.mrb[2].mxu1 }
  0xdf   :  { %v1406_v27 = vpop.f32.mrb[3].mxu1  ;;  %v656_v28 = vsel %vm38_vm0, %v339_v26, -inf }
  0xe0   :  { %v415_v29 = vpop.f32.mrb[4].mxu0 }
  0xe1   :  { %v659_v30 = vsel %vm38_vm0, %v415_v29, -inf  ;;  %v1411_v31 = vpop.f32.mrb[5].mxu0 }
  0xe2   :  { %657 = vmax.xlane.f32.xlu1 %v656_v28  ;;  %660 = vmax.xlane.f32.xlu0 %v659_v30  ;;  %v491_v32 = vpop.f32.mrb[4].mxu1  ;;  %v32_v28 = vld [vmem:[%s1729_s2 + $0x10] sm:$0xff] }
  0xe3   :  { %v1416_v33 = vpop.f32.mrb[5].mxu1  ;;  %v662_v34 = vsel %vm38_vm0, %v491_v32, -inf }
  0xe4   :  { %v567_v35 = vpop.f32.mrb[6].mxu0 }
  0xe5   :  { %v665_v36 = vsel %vm38_vm0, %v567_v35, -inf  ;;  %v1421_v37 = vpop.f32.mrb[7].mxu0 }
  0xe6   :  { %663 = vmax.xlane.f32.xlu1 %v662_v34  ;;  %666 = vmax.xlane.f32.xlu0 %v665_v36  ;;  %v643_v38 = vpop.f32.mrb[6].mxu1  ;;  %v33_v34 = vld [vmem:[%s1729_s2 + $0x18] sm:$0xff]  ;;  %v34_v36 = vld [vmem:[%s1729_s2 + $0x20] sm:$0xff] }
  0xe7   :  { %v1426_v39 = vpop.f32.mrb[7].mxu1  ;;  %v668_v40 = vsel %vm38_vm0, %v643_v38, -inf }
  0xea   :  { %669 = vmax.xlane.f32.xlu1 %v668_v40  ;;  %v35_v40 = vld [vmem:[%s1729_s2 + $0x28] sm:$0xff] }
 0x167   :  { %v649_v41 = vpop.xlane.xlu0 %648 }
 0x168   :  { %v671_v42 = vsub.f32 %v111_v17, %v649_v41 }
 0x16a   :  { %v679_v43 = vmul.f32 1.442695, %v671_v42  ;;  %v36_v42 = vld [vmem:[%s1729_s2 + $0x30] sm:$0xff] }
 0x16b   :  { %v652_v44 = vpop.xlane.xlu0 %651  ;;  %v655_v45 = vpop.xlane.xlu1 %654 }
 0x16c   :  { %1469 = vpow2.f32 %v679_v43  ;;  %v672_v46 = vsub.f32 %v187_v20, %v652_v44  ;;  %v673_v47 = vsub.f32 %v263_v23, %v655_v45 }
 0x16e   :  { %v681_v48 = vmul.f32 1.442695, %v672_v46  ;;  %v683_v49 = vmul.f32 1.442695, %v673_v47  ;;  %v37_v46 = vld [vmem:[%s1729_s2 + $0x38] sm:$0xff] }
 0x16f   :  { %v658_v50 = vpop.xlane.xlu1 %657  ;;  %v661_v51 = vpop.xlane.xlu0 %660 }
 0x170   :  { %1471 = vpow2.f32 %v681_v48  ;;  %v674_v52 = vsub.f32 %v339_v26, %v658_v50  ;;  %v675_v53 = vsub.f32 %v415_v29, %v661_v51 }
 0x171   :  { %1473 = vpow2.f32 %v683_v49 }
 0x172   :  { %v685_v54 = vmul.f32 1.442695, %v674_v52  ;;  %v687_v55 = vmul.f32 1.442695, %v675_v53 }
 0x173   :  { %v664_v56 = vpop.xlane.xlu1 %663  ;;  %v667_v57 = vpop.xlane.xlu0 %666 }
 0x174   :  { %1475 = vpow2.f32 %v685_v54  ;;  %v676_v58 = vsub.f32 %v491_v32, %v664_v56  ;;  %v677_v59 = vsub.f32 %v567_v35, %v667_v57 }
 0x175   :  { %1477 = vpow2.f32 %v687_v55 }
 0x176   :  { %v1470_v60 = vpop.eup %1469  ;;  %v689_v61 = vmul.f32 1.442695, %v676_v58  ;;  %v691_v62 = vmul.f32 1.442695, %v677_v59 }
 0x177   :  { %v670_v63 = vpop.xlane.xlu1 %669  ;;  %v695_v1 = vsel %vm38_vm0, %v1470_v60, 0.0 }
 0x178   :  { %1479 = vpow2.f32 %v689_v61  ;;  %v678_v2 = vsub.f32 %v643_v38, %v670_v63  ;;  %696 = vadd.xlane.f32.xlu0 %v695_v1 }
 0x179   :  { %1481 = vpow2.f32 %v691_v62 }
 0x17a   :  { %v1472_v3 = vpop.eup %1471  ;;  %v693_v4 = vmul.f32 1.442695, %v678_v2 }
 0x17b   :  { %v1474_v5 = vpop.eup %1473  ;;  %v698_v6 = vsel %vm38_vm0, %v1472_v3, 0.0 }
 0x17c   :  { %1483 = vpow2.f32 %v693_v4  ;;  %699 = vadd.xlane.f32.xlu1 %v698_v6  ;;  %v701_v7 = vsel %vm38_vm0, %v1474_v5, 0.0 }
 0x17d   :  { %702 = vadd.xlane.f32.xlu0 %v701_v7 }
 0x17e   :  { %v1476_v8 = vpop.eup %1475 }
 0x17f   :  { %v1478_v9 = vpop.eup %1477  ;;  %v704_v10 = vsel %vm38_vm0, %v1476_v8, 0.0 }
 0x180   :  { %705 = vadd.xlane.f32.xlu1 %v704_v10  ;;  %v707_v11 = vsel %vm38_vm0, %v1478_v9, 0.0 }
 0x181   :  { %708 = vadd.xlane.f32.xlu0 %v707_v11 }
 0x182   :  { %v1630_v12 = vpop.eup %1479 }
 0x183   :  { %v1632_v13 = vpop.eup %1481  ;;  %v710_v14 = vsel %vm38_vm0, %v1630_v12, 0.0 }
 0x184   :  { %711 = vadd.xlane.f32.xlu1 %v710_v14  ;;  %v713_v15 = vsel %vm38_vm0, %v1632_v13, 0.0 }
 0x185   :  { %714 = vadd.xlane.f32.xlu0 %v713_v15 }
 0x186   :  { %v1638_v16 = vpop.eup %1483 }
 0x187   :  { %v716_v17 = vsel %vm38_vm0, %v1638_v16, 0.0 }
 0x188   :  { %717 = vadd.xlane.f32.xlu1 %v716_v17 }
 0x205   :  { %v697_v20 = vpop.xlane.xlu0 %696 }
 0x206   :  { %1485 = vrcp.f32 %v697_v20 }
 0x209   :  { %v700_v21 = vpop.xlane.xlu1 %699 }
 0x20a   :  { %1487 = vrcp.f32 %v700_v21  ;;  %v703_v22 = vpop.xlane.xlu0 %702 }
 0x20b   :  { %1489 = vrcp.f32 %v703_v22 }
 0x20d   :  { %v706_v23 = vpop.xlane.xlu1 %705 }
 0x20e   :  { %1491 = vrcp.f32 %v706_v23  ;;  %v709_v24 = vpop.xlane.xlu0 %708 }
 0x20f   :  { %1493 = vrcp.f32 %v709_v24 }
 0x210   :  { %v1486_v25 = vpop.eup %1485 }
 0x211   :  { %v727_v26 = vmul.f32 %v1486_v25, %v1470_v60  ;;  %v712_v27 = vpop.xlane.xlu1 %711 }
 0x212   :  { %1495 = vrcp.f32 %v712_v27  ;;  %v715_v29 = vpop.xlane.xlu0 %714 }
 0x213   :  { %1497 = vrcp.f32 %v715_v29  ;;  %1430 = vmatmul.mubr.msk.f32.vlgmr.msra.gmra.mrb[8].mxu0 %vm38_vm0, %v727_v26 }
 0x214   :  { %v1488_v30 = vpop.eup %1487  ;;  %1438 = vmatpush3.msra.mxu0 %v32_v28  ;;  %1439 = vmatprep.mubr.msk.f32.mxu0 %vm1502_vm1, %v1501_v0 }
 0x215   :  { %v1490_v31 = vpop.eup %1489  ;;  %v728_v32 = vmul.f32 %v1488_v30, %v1472_v3  ;;  %v718_v33 = vpop.xlane.xlu1 %717  ;;  %1447 = vmatprep.subr.mxu0 %v1501_v0 }
 0x216   :  { %v729_v35 = vmul.f32 %v1490_v31, %v1474_v5  ;;  %1499 = vrcp.f32 %v718_v33 }
 0x217   :  { %1435 = vmatmul.mubr.msk.f32.vlgmr.msra.gmra.mrb[8].mxu1 %vm38_vm0, %v728_v32 }
 0x218   :  { %v1492_v37 = vpop.eup %1491  ;;  %1440 = vmatmul.mubr.msk.f32.vlgmr.msra.gmra.mrb[10].mxu0 %vm38_vm0, %v729_v35  ;;  %1443 = vmatpush3.msra.mxu1 %v33_v34 }
 0x219   :  { %v1494_v38 = vpop.eup %1493  ;;  %v730_v39 = vmul.f32 %v1492_v37, %v1476_v8  ;;  %1444 = vmatprep.mubr.msk.f32.mxu1 %vm1502_vm1, %v1501_v0  ;;  %1448 = vmatpush3.msra.mxu0 %v34_v36 }
 0x21a   :  { %v731_v41 = vmul.f32 %v1494_v38, %v1478_v9  ;;  %1449 = vmatprep.mubr.msk.f32.mxu0 %vm1502_vm1, %v1501_v0  ;;  %1452 = vmatprep.subr.mxu1 %v1501_v0 }
 0x21b   :  { %1445 = vmatmul.mubr.msk.f32.vlgmr.msra.gmra.mrb[10].mxu1 %vm38_vm0, %v730_v39  ;;  %1457 = vmatprep.subr.mxu0 %v1501_v0 }
 0x21c   :  { %v1496_v43 = vpop.eup %1495  ;;  %1450 = vmatmul.mubr.msk.f32.vlgmr.msra.gmra.mrb[12].mxu0 %vm38_vm0, %v731_v41  ;;  %1453 = vmatpush3.msra.mxu1 %v35_v40 }
 0x21d   :  { %v1498_v44 = vpop.eup %1497  ;;  %v732_v45 = vmul.f32 %v1496_v43, %v1630_v12  ;;  %1454 = vmatprep.mubr.msk.f32.mxu1 %vm1502_vm1, %v1501_v0  ;;  %1458 = vmatpush3.msra.mxu0 %v36_v42 }
 0x21e   :  { %v733_v47 = vmul.f32 %v1498_v44, %v1632_v13  ;;  %1459 = vmatprep.mubr.msk.f32.mxu0 %vm1502_vm1, %v1501_v0  ;;  %1462 = vmatprep.subr.mxu1 %v1501_v0 }
 0x21f   :  { %1455 = vmatmul.mubr.msk.f32.vlgmr.msra.gmra.mrb[12].mxu1 %vm38_vm0, %v732_v45 }
 0x220   :  { %v1500_v48 = vpop.eup %1499  ;;  %1460 = vmatmul.mubr.msk.f32.vlgmr.msra.gmra.mrb[14].mxu0 %vm38_vm0, %v733_v47  ;;  %1463 = vmatpush3.msra.mxu1 %v37_v46 }
 0x221   :  { %v734_v49 = vmul.f32 %v1500_v48, %v1638_v16  ;;  %1464 = vmatprep.mubr.msk.f32.mxu1 %vm1502_vm1, %v1501_v0 }
 0x223   :  { %1465 = vmatmul.mubr.msk.f32.vlgmr.msra.gmra.mrb[14].mxu1 %vm38_vm0, %v734_v49 }
 0x2e6   :  { %v804_v50 = vpop.f32.mrb[8].mxu0 }
 0x2e7   :  { %1319 = vst.msk [vmem:[%s1730_s3] sm:$0xff] %vm38_vm0, %v804_v50  ;;  %v1431_v51 = vpop.f32.mrb[9].mxu0 }
 0x2ea   :  { %v877_v52 = vpop.f32.mrb[8].mxu1 }
 0x2eb   :  { %1320 = vst.msk [vmem:[%s1730_s3 + $0x8] sm:$0xff] %vm38_vm0, %v877_v52  ;;  %v950_v53 = vpop.f32.mrb[10].mxu0  ;;  %v1436_v54 = vpop.f32.mrb[9].mxu1 }
 0x2ec   :  { %1321 = vst.msk [vmem:[%s1730_s3 + $0x10] sm:$0xff] %vm38_vm0, %v950_v53  ;;  %v1441_v0 = vpop.f32.mrb[11].mxu0 }
 0x2ee   :  { %v1023_v55 = vpop.f32.mrb[10].mxu1 }
 0x2ef   :  { %1322 = vst.msk [vmem:[%s1730_s3 + $0x18] sm:$0xff] %vm38_vm0, %v1023_v55  ;;  %v1096_v56 = vpop.f32.mrb[12].mxu0  ;;  %v1446_v57 = vpop.f32.mrb[11].mxu1 }
 0x2f0   :  { %1323 = vst.msk [vmem:[%s1730_s3 + $0x20] sm:$0xff] %vm38_vm0, %v1096_v56  ;;  %v1451_v58 = vpop.f32.mrb[13].mxu0 }
 0x2f2   :  { %v1169_v59 = vpop.f32.mrb[12].mxu1 }
 0x2f3   :  { %1324 = vst.msk [vmem:[%s1730_s3 + $0x28] sm:$0xff] %vm38_vm0, %v1169_v59  ;;  %v1242_v60 = vpop.f32.mrb[14].mxu0  ;;  %v1456_v61 = vpop.f32.mrb[13].mxu1 }
 0x2f4   :  { %1325 = vst.msk [vmem:[%s1730_s3 + $0x30] sm:$0xff] %vm38_vm0, %v1242_v60  ;;  %v1461_v62 = vpop.f32.mrb[15].mxu0 }
 0x2f6   :  { %v1315_v63 = vpop.f32.mrb[14].mxu1 }
 0x2f7   :  { %1326 = vst.msk [vmem:[%s1730_s3 + $0x38] sm:$0xff] %vm38_vm0, %v1315_v63  ;;  %v1466_v1 = vpop.f32.mrb[15].mxu1 }

</bundles_post_ra>
